<compile_context>
chip_gen: v6e
topology: v6e:2x2x1
jax: 0.10.0
libtpu: 0.0.40
codegen_flags: <defaults>
</compile_context>

<pallas_src>
import jax
import jax.numpy as jnp
from jax.experimental import pallas as pl
from jax.experimental.pallas import tpu as pltpu

NUM_EMBED = 50  # nn.Embedding(50, num_pos_feats)


def _pos_embed_kernel(col_t_ref, row_t_ref, out_ref):
    # col_t_ref: [F, W]  (col_embed[:W].T, already sliced/transposed in wrapper)
    # row_t_ref: [F, H]  (row_embed[:H].T)
    # out_ref:   [F, H, W]  -- grid step 0 owns channels [0, F) (col half),
    #                          grid step 1 owns channels [F, 2F) (row half).
    F, H, W = out_ref.shape
    part = pl.program_id(0)

    @pl.when(part == 0)
    def _():
        # out[c, h, w] = col_embed[w, c]  (broadcast along H = sublane axis)
        out_ref[...] = jnp.broadcast_to(col_t_ref[...][:, None, :], (F, H, W))

    @pl.when(part == 1)
    def _():
        # out[c, h, w] = row_embed[h, c]  (broadcast along W = lane axis)
        out_ref[...] = jnp.broadcast_to(row_t_ref[...][:, :, None], (F, H, W))


def position_embedding_learned(x, col_embed, row_embed):
    """x: [B, C, H, W]; col_embed/row_embed: [50, F]. Returns [B, 2F, H, W]."""
    B = x.shape[0]
    H, W = x.shape[-2], x.shape[-1]
    F = col_embed.shape[-1]

    if H > NUM_EMBED or W > NUM_EMBED:
        # PyTorch would raise an embedding index error; mirror that explicitly.
        raise ValueError(
            f"H={H}, W={W} exceed embedding table size {NUM_EMBED}")

    # Tiny layout plumbing on the parameters (50*F elements): slice to the rows
    # actually used and transpose so the kernel needs no XLU work at all.
    col_t = jnp.transpose(col_embed[:W, :])  # [F, W]
    row_t = jnp.transpose(row_embed[:H, :])  # [F, H]

    pos = pl.pallas_call(
        _pos_embed_kernel,
        out_shape=jax.ShapeDtypeStruct((2 * F, H, W), col_embed.dtype),
        grid_spec=pltpu.PrefetchScalarGridSpec(
            num_scalar_prefetch=0,
            grid=(2,),  # step 0: col half, step 1: row half (independent)
            in_specs=[
                pl.BlockSpec((F, W), lambda p: (0, 0)),
                pl.BlockSpec((F, H), lambda p: (0, 0)),
            ],
            # Last two block dims are the full (H, W) extents -> contiguous
            # HBM writeback; each step writes a contiguous channel half.
            out_specs=pl.BlockSpec((F, H, W), lambda p: (p, 0, 0)),
        ),
        compiler_params=pltpu.CompilerParams(
            dimension_semantics=("parallel",)),
    )(col_t, row_t)  # [2F, H, W]

    # Batch-invariant result: broadcast over B (no kernel-side duplication).
    return jnp.broadcast_to(pos[None], (B, 2 * F, H, W))


def _reference(x, col_embed, row_embed):
    B = x.shape[0]
    H, W = x.shape[-2], x.shape[-1]
    x_emb = col_embed[:W]                                   # [W, F]
    y_emb = row_embed[:H]                                   # [H, F]
    xb = jnp.broadcast_to(x_emb[None, :, :], (H, W, x_emb.shape[-1]))
    yb = jnp.broadcast_to(y_emb[:, None, :], (H, W, y_emb.shape[-1]))
    pos = jnp.concatenate([xb, yb], axis=-1)                # [H, W, 2F]
    pos = jnp.transpose(pos, (2, 0, 1))                     # [2F, H, W]
    return jnp.broadcast_to(pos[None], (B,) + pos.shape)    # [B, 2F, H, W]


if __name__ == "__main__":
    key = jax.random.PRNGKey(0)
    k_col, k_row, k_x = jax.random.split(key, 3)

    # Small shapes consistent with the module's forward.
    B, C, H, W = 2, 4, 16, 16
    F = 32  # num_pos_feats (256 in the original module; small here)

    # Deterministic "learned" parameters: nn.init.uniform_ -> U[0, 1).
    col_embed = jax.random.uniform(k_col, (NUM_EMBED, F), dtype=jnp.float32)
    row_embed = jax.random.uniform(k_row, (NUM_EMBED, F), dtype=jnp.float32)

    x = jax.random.normal(k_x, (B, C, H, W), dtype=jnp.float32)

    pos = position_embedding_learned(x, col_embed, row_embed)
    pos = jax.block_until_ready(pos)

    ref = _reference(x, col_embed, row_embed)
    assert pos.shape == (B, 2 * F, H, W), pos.shape
    assert pos.dtype == jnp.float32
    assert jnp.allclose(pos, ref), "mismatch vs reference"

    print("KERNEL_OK")
</pallas_src>

<mosaic_0001>
module attributes {stable_mosaic.version = 11 : i64} {
  func.func @_pos_embed_kernel(%arg0: i32, %arg1: memref<32x16xf32, #tpu.memory_space<vmem>>, %arg2: memref<32x16xf32, #tpu.memory_space<vmem>>, %arg3: memref<32x16x16xf32, #tpu.memory_space<vmem>>) attributes {dimension_semantics = [#tpu.dimension_semantics<parallel>], iteration_bounds = array<i64: 2>, scalar_prefetch = 0 : i64, scratch_operands = 0 : i64, tpu.core_type = #tpu.core_type<tc>, window_params = [{pipeline_mode = #tpu.pipeline_mode<synchronous>, transform_indices = @transform_0, window_bounds = array<i64: 32, 16>}, {pipeline_mode = #tpu.pipeline_mode<synchronous>, transform_indices = @transform_1, window_bounds = array<i64: 32, 16>}, {transform_indices = @transform_2, window_bounds = array<i64: 32, 16, 16>}]} {
    %c0_i32 = arith.constant 0 : i32
    %0 = arith.cmpi eq, %arg0, %c0_i32 : i32
    %1 = arith.extui %0 : i1 to i32
    %c0_i32_0 = arith.constant 0 : i32
    %2 = arith.cmpi ne, %1, %c0_i32_0 : i32
    scf.if %2 {
      %c0 = arith.constant 0 : index
      %c0_2 = arith.constant 0 : index
      %6 = vector.load %arg1[%c0, %c0_2] : memref<32x16xf32, #tpu.memory_space<vmem>>, vector<32x16xf32>
      %7 = vector.shape_cast %6 : vector<32x16xf32> to vector<32x1x16xf32>
      %8 = vector.shape_cast %7 : vector<32x1x16xf32> to vector<32x1x16xf32>
      %9 = vector.broadcast %8 : vector<32x1x16xf32> to vector<32x16x16xf32>
      %c0_3 = arith.constant 0 : index
      %c0_4 = arith.constant 0 : index
      %c0_5 = arith.constant 0 : index
      %10 = vector.load %arg3[%c0_3, %c0_4, %c0_5] : memref<32x16x16xf32, #tpu.memory_space<vmem>>, vector<32x16x16xf32>
      tpu.vector_store %arg3[%c0_3, %c0_4, %c0_5], %9 {strides = array<i32>} : memref<32x16x16xf32, #tpu.memory_space<vmem>>, vector<32x16x16xf32>,
    } else {
    }
    %c1_i32 = arith.constant 1 : i32
    %3 = arith.cmpi eq, %arg0, %c1_i32 : i32
    %4 = arith.extui %3 : i1 to i32
    %c0_i32_1 = arith.constant 0 : i32
    %5 = arith.cmpi ne, %4, %c0_i32_1 : i32
    scf.if %5 {
      %c0 = arith.constant 0 : index
      %c0_2 = arith.constant 0 : index
      %6 = vector.load %arg2[%c0, %c0_2] : memref<32x16xf32, #tpu.memory_space<vmem>>, vector<32x16xf32>
      %7 = vector.shape_cast %6 : vector<32x16xf32> to vector<32x16x1xf32>
      %8 = vector.shape_cast %7 : vector<32x16x1xf32> to vector<32x16x1xf32>
      %9 = vector.broadcast %8 : vector<32x16x1xf32> to vector<32x16x16xf32>
      %c0_3 = arith.constant 0 : index
      %c0_4 = arith.constant 0 : index
      %c0_5 = arith.constant 0 : index
      %10 = vector.load %arg3[%c0_3, %c0_4, %c0_5] : memref<32x16x16xf32, #tpu.memory_space<vmem>>, vector<32x16x16xf32>
      tpu.vector_store %arg3[%c0_3, %c0_4, %c0_5], %9 {strides = array<i32>} : memref<32x16x16xf32, #tpu.memory_space<vmem>>, vector<32x16x16xf32>,
    } else {
    }
    return
  }
  func.func @transform_0(%arg0: i32) -> (i32, i32) {
    %c0_i32 = arith.constant 0 : i32
    %c0_i32_0 = arith.constant 0 : i32
    %c0_i32_1 = arith.constant 0 : i32
    return %c0_i32, %c0_i32_0 : i32, i32
  }
  func.func @transform_1(%arg0: i32) -> (i32, i32) {
    %c0_i32 = arith.constant 0 : i32
    %c0_i32_0 = arith.constant 0 : i32
    %c0_i32_1 = arith.constant 0 : i32
    return %c0_i32, %c0_i32_0 : i32, i32
  }
  func.func @transform_2(%arg0: i32) -> (i32, i32, i32) {
    %c0_i32 = arith.constant 0 : i32
    %c0_i32_0 = arith.constant 0 : i32
    %c0_i32_1 = arith.constant 0 : i32
    return %arg0, %c0_i32, %c0_i32_0 : i32, i32, i32
  }
}

</mosaic_0001>

<bundles_post_ra>
// kernel: tpu_custom_call.1
= control target key start
LH: loop header
LB: loop body
LE: loop exit
PB: predicated region body
PF: predicated region fallthrough
CT: control target
= control target key end

     0   :  { %s1076_s9 = smov 0   ;;  %s1505_s0 = inlined_call_operand.vmem [shape: f32[32,16], index: 0, kind: input, shape index: {}]   ;;  %s1506_s1 = inlined_call_operand.vmem [shape: f32[32,16], index: 1, kind: input, shape index: {}]   ;;  %s1507_s2 = inlined_call_operand.vmem [shape: f32[64,16,16], index: 2, kind: output, shape index: {}]  }
   0x1 LB: > { %s1082_s10 = sadd.s32 4294967295, %s1058_s9   ;;  %p1034_p0 = scmp.ge.s32.totalorder %s1058_s9, 1  ;;  %s1058_s9 = sphi %s1076_s9, %s12_s9  }
   0x2   : > { %p102_p1 = scmp.lt.s32.totalorder %s1058_s9, 3 }
   0x4   : > { %p103_p2 = pnand %p1034_p0, %p102_p1 }
   0x5   : > { %s1035_s11 = sshll.u32 (!%p103_p2), %s1082_s10, 5  ;;  %p1038_p4 = scmp.ne.s32.totalorder (!%p103_p2), %s1082_s10, 0 }
   0x6   : > { %106 = sbr.rel (%p103_p2) target bundleno = 316 (0x13c), region = 28  ;;  %p121_p3 = scmp.lt.s32.totalorder (!%p103_p2), %s1035_s11, 63 }
   0xb   : > { %s1509_s11 = smov (!%p121_p3, %s1035_s11), 63  ;;  %130 = sbr.rel (%p1038_p4) target bundleno = 61 (0x3d), region = 32 }
   0xc   : > { %s1042_s12 = sshll.u32 %s1509_s11, 4 }
   0xd   : > { %s1090_s15 = scalar_lea.vmem %s1507_s2, %s1042_s12 }
  0x10   : > { %v131_v0 = vld [vmem:[%s1505_s0] sm:$0xff]  ;;  %v143_v1 = vlaneseq  ;;  %v132_v2 = vld [vmem:[%s1505_s0 + $0x8] sm:$0xff]  ;;  %v1060_v3 = vmov 1966171168   ;;  %v133_v5 = vld [vmem:[%s1505_s0 + $0x10] sm:$0xff]  ;;  %vm495_vm0 = vcmask 130048  }
  0x11   : > { %v141_v4 = vunpack.c.l.s4 %v1060_v3  ;;  %v134_v6 = vld [vmem:[%s1505_s0 + $0x18] sm:$0xff]  ;;  %v139_v9 = vcombine.high %v131_v0, %v131_v0  ;;  %v188_v10 = vcombine.high %v132_v2, %v132_v2  ;;  %v237_v11 = vcombine.high %v133_v5, %v133_v5 }
  0x12   : > { %v144_v7 = vshrl.u32 %v143_v1, 7  ;;  %v286_v12 = vcombine.high %v134_v6, %v134_v6 }
  0x13   : > { %v142_v8 = vunpack.c.0.s8 %v141_v4 }
  0x14   : > { %v1107_v14 = vsub.s32 0, %v144_v7 }
  0x15   : > { %v1105_v13 = vsub.s32 %v142_v8, %v144_v7 }
  0x17   : > { %v146_v15 = vrot.slane %v131_v0, %v1105_v13  ;;  %v153_v16 = vrot.slane %v139_v9, %v1105_v13  ;;  %v195_v17 = vrot.slane %v132_v2, %v1105_v13  ;;  %v202_v18 = vrot.slane %v188_v10, %v1105_v13 }
  0x18   : > { %v1114_v19 = vrot.slane %v133_v5, %v1105_v13  ;;  %v1117_v20 = vrot.slane %v237_v11, %v1105_v13  ;;  %v1120_v21 = vrot.slane %v134_v6, %v1105_v13  ;;  %v1123_v22 = vrot.slane %v286_v12, %v1105_v13 }
  0x19   : > { %v162_v23 = vrot.slane %v146_v15, %v1105_v13  ;;  %v154_v24 = vcombine.high %v146_v15, %v146_v15  ;;  %v169_v25 = vrot.slane %v153_v16, %v1105_v13  ;;  %v155_v26 = vcombine.high %v153_v16, %v153_v16 }
  0x1a   : > { %v211_v27 = vrot.slane %v195_v17, %v1105_v13  ;;  %v203_v28 = vcombine.high %v195_v17, %v195_v17  ;;  %v218_v29 = vrot.slane %v202_v18, %v1105_v13  ;;  %v204_v30 = vcombine.high %v202_v18, %v202_v18 }
  0x1b   : > { %v338_v31 = vrot.slane %v162_v23, %v1107_v14  ;;  %v176_v32 = vrot.slane %v154_v24, %v1105_v13  ;;  %v184_v33 = vcombine.high %v162_v23, %v162_v23  ;;  %v354_v34 = vrot.slane %v169_v25, %v1107_v14 }
  0x1c   : > { %v183_v35 = vrot.slane %v155_v26, %v1105_v13  ;;  %v185_v36 = vcombine.high %v169_v25, %v169_v25  ;;  %v370_v37 = vrot.slane %v211_v27, %v1107_v14  ;;  %v225_v38 = vrot.slane %v203_v28, %v1105_v13 }
  0x1d   : > { %496 = vst.msk [vmem:[%s1090_s15] sm:$0xff] %vm495_vm0, %v338_v31  ;;  %497 = vst.msk [vmem:[%s1090_s15 + $0x8] sm:$0xff] %vm495_vm0, %v338_v31  ;;  %v342_v39 = vrot.slane %v176_v32, %v1107_v14  ;;  %v346_v40 = vrot.slane %v184_v33, %v1107_v14  ;;  %v186_v41 = vcombine.high %v176_v32, %v176_v32 }
  0x1e   : > { %504 = vst.msk [vmem:[%s1090_s15 + $0x40] sm:$0xff] %vm495_vm0, %v354_v34  ;;  %505 = vst.msk [vmem:[%s1090_s15 + $0x48] sm:$0xff] %vm495_vm0, %v354_v34  ;;  %v233_v42 = vcombine.high %v211_v27, %v211_v27  ;;  %v358_v43 = vrot.slane %v183_v35, %v1107_v14  ;;  %v362_v44 = vrot.slane %v185_v36, %v1107_v14 }
  0x1f   : > { %v187_v45 = vcombine.high %v183_v35, %v183_v35  ;;  %512 = vst.msk [vmem:[%s1090_s15 + $0x80] sm:$0xff] %vm495_vm0, %v370_v37  ;;  %513 = vst.msk [vmem:[%s1090_s15 + $0x88] sm:$0xff] %vm495_vm0, %v370_v37  ;;  %v374_v46 = vrot.slane %v225_v38, %v1107_v14  ;;  %v350_v47 = vrot.slane %v186_v41, %v1107_v14 }
  0x20   : > { %498 = vst.msk [vmem:[%s1090_s15 + $0x10] sm:$0xff] %vm495_vm0, %v342_v39  ;;  %499 = vst.msk [vmem:[%s1090_s15 + $0x18] sm:$0xff] %vm495_vm0, %v342_v39  ;;  %v378_v48 = vrot.slane %v233_v42, %v1107_v14  ;;  %v235_v49 = vcombine.high %v225_v38, %v225_v38  ;;  %v386_v50 = vrot.slane %v218_v29, %v1107_v14 }
  0x21   : > { %500 = vst.msk [vmem:[%s1090_s15 + $0x20] sm:$0xff] %vm495_vm0, %v346_v40  ;;  %501 = vst.msk [vmem:[%s1090_s15 + $0x28] sm:$0xff] %vm495_vm0, %v346_v40  ;;  %v366_v51 = vrot.slane %v187_v45, %v1107_v14  ;;  %v232_v52 = vrot.slane %v204_v30, %v1105_v13  ;;  %v234_v53 = vcombine.high %v218_v29, %v218_v29 }
  0x22   : > { %506 = vst.msk [vmem:[%s1090_s15 + $0x50] sm:$0xff] %vm495_vm0, %v358_v43  ;;  %507 = vst.msk [vmem:[%s1090_s15 + $0x58] sm:$0xff] %vm495_vm0, %v358_v43  ;;  %v260_v54 = vrot.slane %v1114_v19, %v1105_v13  ;;  %v382_v55 = vrot.slane %v235_v49, %v1107_v14  ;;  %v252_v56 = vcombine.high %v1114_v19, %v1114_v19 }
  0x23   : > { %508 = vst.msk [vmem:[%s1090_s15 + $0x60] sm:$0xff] %vm495_vm0, %v362_v44  ;;  %509 = vst.msk [vmem:[%s1090_s15 + $0x68] sm:$0xff] %vm495_vm0, %v362_v44  ;;  %v267_v57 = vrot.slane %v1117_v20, %v1105_v13  ;;  %v253_v58 = vcombine.high %v1117_v20, %v1117_v20  ;;  %v390_v59 = vrot.slane %v232_v52, %v1107_v14 }
  0x24   : > { %514 = vst.msk [vmem:[%s1090_s15 + $0x90] sm:$0xff] %vm495_vm0, %v374_v46  ;;  %515 = vst.msk [vmem:[%s1090_s15 + $0x98] sm:$0xff] %vm495_vm0, %v374_v46  ;;  %v394_v60 = vrot.slane %v234_v53, %v1107_v14  ;;  %v236_v61 = vcombine.high %v232_v52, %v232_v52  ;;  %v402_v62 = vrot.slane %v260_v54, %v1107_v14 }
  0x25   : > { %502 = vst.msk [vmem:[%s1090_s15 + $0x30] sm:$0xff] %vm495_vm0, %v350_v47  ;;  %503 = vst.msk [vmem:[%s1090_s15 + $0x38] sm:$0xff] %vm495_vm0, %v350_v47  ;;  %v274_v63 = vrot.slane %v252_v56, %v1105_v13  ;;  %v282_v0 = vcombine.high %v260_v54, %v260_v54  ;;  %v418_v1 = vrot.slane %v267_v57, %v1107_v14 }
  0x26   : > { %516 = vst.msk [vmem:[%s1090_s15 + $0xa0] sm:$0xff] %vm495_vm0, %v378_v48  ;;  %517 = vst.msk [vmem:[%s1090_s15 + $0xa8] sm:$0xff] %vm495_vm0, %v378_v48  ;;  %v281_v2 = vrot.slane %v253_v58, %v1105_v13  ;;  %v398_v3 = vrot.slane %v236_v61, %v1107_v14  ;;  %v283_v4 = vcombine.high %v267_v57, %v267_v57 }
  0x27   : > { %520 = vst.msk [vmem:[%s1090_s15 + $0xc0] sm:$0xff] %vm495_vm0, %v386_v50  ;;  %521 = vst.msk [vmem:[%s1090_s15 + $0xc8] sm:$0xff] %vm495_vm0, %v386_v50  ;;  %v309_v5 = vrot.slane %v1120_v21, %v1105_v13  ;;  %v301_v6 = vcombine.high %v1120_v21, %v1120_v21  ;;  %v406_v7 = vrot.slane %v274_v63, %v1107_v14 }
  0x28   : > { %510 = vst.msk [vmem:[%s1090_s15 + $0x70] sm:$0xff] %vm495_vm0, %v366_v51  ;;  %511 = vst.msk [vmem:[%s1090_s15 + $0x78] sm:$0xff] %vm495_vm0, %v366_v51  ;;  %v410_v8 = vrot.slane %v282_v0, %v1107_v14  ;;  %v284_v9 = vcombine.high %v274_v63, %v274_v63  ;;  %v422_v10 = vrot.slane %v281_v2, %v1107_v14 }
  0x29   : > { %518 = vst.msk [vmem:[%s1090_s15 + $0xb0] sm:$0xff] %vm495_vm0, %v382_v55  ;;  %519 = vst.msk [vmem:[%s1090_s15 + $0xb8] sm:$0xff] %vm495_vm0, %v382_v55  ;;  %v426_v11 = vrot.slane %v283_v4, %v1107_v14  ;;  %v285_v12 = vcombine.high %v281_v2, %v281_v2  ;;  %v434_v15 = vrot.slane %v309_v5, %v1107_v14 }
  0x2a   : > { %522 = vst.msk [vmem:[%s1090_s15 + $0xd0] sm:$0xff] %vm495_vm0, %v390_v59  ;;  %523 = vst.msk [vmem:[%s1090_s15 + $0xd8] sm:$0xff] %vm495_vm0, %v390_v59  ;;  %v323_v16 = vrot.slane %v301_v6, %v1105_v13  ;;  %v414_v17 = vrot.slane %v284_v9, %v1107_v14  ;;  %v331_v18 = vcombine.high %v309_v5, %v309_v5 }
  0x2b   : > { %524 = vst.msk [vmem:[%s1090_s15 + $0xe0] sm:$0xff] %vm495_vm0, %v394_v60  ;;  %525 = vst.msk [vmem:[%s1090_s15 + $0xe8] sm:$0xff] %vm495_vm0, %v394_v60  ;;  %v316_v19 = vrot.slane %v1123_v22, %v1105_v13  ;;  %v302_v20 = vcombine.high %v1123_v22, %v1123_v22  ;;  %v430_v21 = vrot.slane %v285_v12, %v1107_v14 }
  0x2c   : > { %528 = vst.msk [vmem:[%s1090_s15 + $0x100] sm:$0xff] %vm495_vm0, %v402_v62  ;;  %529 = vst.msk [vmem:[%s1090_s15 + $0x108] sm:$0xff] %vm495_vm0, %v402_v62  ;;  %v438_v23 = vrot.slane %v323_v16, %v1107_v14  ;;  %v333_v24 = vcombine.high %v323_v16, %v323_v16  ;;  %v442_v22 = vrot.slane %v331_v18, %v1107_v14 }
  0x2d   : > { %536 = vst.msk [vmem:[%s1090_s15 + $0x140] sm:$0xff] %vm495_vm0, %v418_v1  ;;  %537 = vst.msk [vmem:[%s1090_s15 + $0x148] sm:$0xff] %vm495_vm0, %v418_v1  ;;  %v450_v25 = vrot.slane %v316_v19, %v1107_v14  ;;  %v330_v26 = vrot.slane %v302_v20, %v1105_v13  ;;  %v332_v27 = vcombine.high %v316_v19, %v316_v19 }
  0x2e   : > { %526 = vst.msk [vmem:[%s1090_s15 + $0xf0] sm:$0xff] %vm495_vm0, %v398_v3  ;;  %527 = vst.msk [vmem:[%s1090_s15 + $0xf8] sm:$0xff] %vm495_vm0, %v398_v3  ;;  %v446_v28 = vrot.slane %v333_v24, %v1107_v14 }
  0x2f   : > { %530 = vst.msk [vmem:[%s1090_s15 + $0x110] sm:$0xff] %vm495_vm0, %v406_v7  ;;  %531 = vst.msk [vmem:[%s1090_s15 + $0x118] sm:$0xff] %vm495_vm0, %v406_v7  ;;  %v454_v13 = vrot.slane %v330_v26, %v1107_v14  ;;  %v458_v29 = vrot.slane %v332_v27, %v1107_v14  ;;  %v334_v30 = vcombine.high %v330_v26, %v330_v26 }
  0x30   : > { %532 = vst.msk [vmem:[%s1090_s15 + $0x120] sm:$0xff] %vm495_vm0, %v410_v8  ;;  %533 = vst.msk [vmem:[%s1090_s15 + $0x128] sm:$0xff] %vm495_vm0, %v410_v8 }
  0x31   : > { %538 = vst.msk [vmem:[%s1090_s15 + $0x150] sm:$0xff] %vm495_vm0, %v422_v10  ;;  %539 = vst.msk [vmem:[%s1090_s15 + $0x158] sm:$0xff] %vm495_vm0, %v422_v10  ;;  %v462_v31 = vrot.slane %v334_v30, %v1107_v14 }
  0x32   : > { %540 = vst.msk [vmem:[%s1090_s15 + $0x160] sm:$0xff] %vm495_vm0, %v426_v11  ;;  %541 = vst.msk [vmem:[%s1090_s15 + $0x168] sm:$0xff] %vm495_vm0, %v426_v11 }
  0x33   : > { %544 = vst.msk [vmem:[%s1090_s15 + $0x180] sm:$0xff] %vm495_vm0, %v434_v15  ;;  %545 = vst.msk [vmem:[%s1090_s15 + $0x188] sm:$0xff] %vm495_vm0, %v434_v15 }
  0x34   : > { %534 = vst.msk [vmem:[%s1090_s15 + $0x130] sm:$0xff] %vm495_vm0, %v414_v17  ;;  %535 = vst.msk [vmem:[%s1090_s15 + $0x138] sm:$0xff] %vm495_vm0, %v414_v17 }
  0x35   : > { %542 = vst.msk [vmem:[%s1090_s15 + $0x170] sm:$0xff] %vm495_vm0, %v430_v21  ;;  %543 = vst.msk [vmem:[%s1090_s15 + $0x178] sm:$0xff] %vm495_vm0, %v430_v21 }
  0x36   : > { %546 = vst.msk [vmem:[%s1090_s15 + $0x190] sm:$0xff] %vm495_vm0, %v438_v23  ;;  %547 = vst.msk [vmem:[%s1090_s15 + $0x198] sm:$0xff] %vm495_vm0, %v438_v23 }
  0x37   : > { %548 = vst.msk [vmem:[%s1090_s15 + $0x1a0] sm:$0xff] %vm495_vm0, %v442_v22  ;;  %549 = vst.msk [vmem:[%s1090_s15 + $0x1a8] sm:$0xff] %vm495_vm0, %v442_v22 }
  0x38   : > { %552 = vst.msk [vmem:[%s1090_s15 + $0x1c0] sm:$0xff] %vm495_vm0, %v450_v25  ;;  %553 = vst.msk [vmem:[%s1090_s15 + $0x1c8] sm:$0xff] %vm495_vm0, %v450_v25 }
  0x39   : > { %550 = vst.msk [vmem:[%s1090_s15 + $0x1b0] sm:$0xff] %vm495_vm0, %v446_v28  ;;  %551 = vst.msk [vmem:[%s1090_s15 + $0x1b8] sm:$0xff] %vm495_vm0, %v446_v28 }
  0x3a   : > { %554 = vst.msk [vmem:[%s1090_s15 + $0x1d0] sm:$0xff] %vm495_vm0, %v454_v13  ;;  %555 = vst.msk [vmem:[%s1090_s15 + $0x1d8] sm:$0xff] %vm495_vm0, %v454_v13 }
  0x3b   : > { %556 = vst.msk [vmem:[%s1090_s15 + $0x1e0] sm:$0xff] %vm495_vm0, %v458_v29  ;;  %557 = vst.msk [vmem:[%s1090_s15 + $0x1e8] sm:$0xff] %vm495_vm0, %v458_v29 }
  0x3c   : > { %558 = vst.msk [vmem:[%s1090_s15 + $0x1f0] sm:$0xff] %vm495_vm0, %v462_v31  ;;  %559 = vst.msk [vmem:[%s1090_s15 + $0x1f8] sm:$0xff] %vm495_vm0, %v462_v31 }
  0x3d PF: > { %p1039_p5 = scmp.ne.s32.totalorder %s1082_s10, 1 }
  0x3f   : > { %563 = sbr.rel (%p1039_p5) target bundleno = 316 (0x13c), region = 36 }
  0x44   : > { %v568_v32 = vlaneseq  ;;  %v564_v34 = vld [vmem:[%s1506_s1] sm:$0xff]  ;;  %v565_v50 = vld [vmem:[%s1506_s1 + $0x8] sm:$0xff]  ;;  %v566_v59 = vld [vmem:[%s1506_s1 + $0x10] sm:$0xff]  ;;  %vm920_vm1 = vcmask 130048  }
  0x45   : > { %v567_v4 = vld [vmem:[%s1506_s1 + $0x18] sm:$0xff] }
  0x46   : > { %v569_v33 = vshrl.u32 %v568_v32, 7 }
  0x48   : > { %v1317_v35 = vsub.s32 1, %v569_v33  ;;  %v1319_v36 = vsub.s32 0, %v569_v33  ;;  %v1323_v38 = vsub.s32 2, %v569_v33  ;;  %v1326_v40 = vsub.s32 3, %v569_v33 }
  0x49   : > { %v1329_v42 = vsub.s32 4, %v569_v33  ;;  %v1332_v44 = vsub.s32 5, %v569_v33  ;;  %v1335_v46 = vsub.s32 6, %v569_v33  ;;  %v1338_v48 = vsub.s32 7, %v569_v33 }
  0x4a   : > { %v582_v14 = vrot.slane %v564_v34, %v1317_v35  ;;  %v571_v37 = vrot.slane %v564_v34, %v1319_v36  ;;  %v593_v39 = vrot.slane %v564_v34, %v1323_v38  ;;  %v604_v41 = vrot.slane %v564_v34, %v1326_v40 }
  0x4b   : > { %v615_v43 = vrot.slane %v564_v34, %v1329_v42  ;;  %v626_v45 = vrot.slane %v564_v34, %v1332_v44  ;;  %v637_v47 = vrot.slane %v564_v34, %v1335_v46  ;;  %v648_v49 = vrot.slane %v564_v34, %v1338_v48 }
  0x4c   : > { %584 = vbcast.lane.b32.xlu1 %v582_v14, 256  ;;  %573 = vbcast.lane.b32.xlu0 %v571_v37, 256  ;;  %v659_v51 = vrot.slane %v565_v50, %v1319_v36  ;;  %v670_v52 = vrot.slane %v565_v50, %v1317_v35  ;;  %v681_v53 = vrot.slane %v565_v50, %v1323_v38 }
  0x4d   : > { %v692_v54 = vrot.slane %v565_v50, %v1326_v40  ;;  %v703_v55 = vrot.slane %v565_v50, %v1329_v42  ;;  %v714_v56 = vrot.slane %v565_v50, %v1332_v44  ;;  %v725_v57 = vrot.slane %v565_v50, %v1335_v46 }
  0x4e   : > { %v736_v58 = vrot.slane %v565_v50, %v1338_v48  ;;  %v747_v60 = vrot.slane %v566_v59, %v1319_v36  ;;  %v758_v61 = vrot.slane %v566_v59, %v1317_v35  ;;  %v769_v62 = vrot.slane %v566_v59, %v1323_v38 }
  0x4f   : > { %v780_v63 = vrot.slane %v566_v59, %v1326_v40  ;;  %v791_v0 = vrot.slane %v566_v59, %v1329_v42  ;;  %v802_v1 = vrot.slane %v566_v59, %v1332_v44  ;;  %v813_v2 = vrot.slane %v566_v59, %v1335_v46 }
  0x50   : > { %588 = vbcast.lane.b32.xlu1 %v582_v14, 264  ;;  %577 = vbcast.lane.b32.xlu0 %v571_v37, 264  ;;  %v824_v3 = vrot.slane %v566_v59, %v1338_v48  ;;  %v835_v5 = vrot.slane %v567_v4, %v1319_v36  ;;  %v846_v6 = vrot.slane %v567_v4, %v1317_v35 }
  0x51   : > { %v857_v7 = vrot.slane %v567_v4, %v1323_v38  ;;  %v868_v8 = vrot.slane %v567_v4, %v1326_v40  ;;  %v879_v9 = vrot.slane %v567_v4, %v1329_v42  ;;  %v890_v10 = vrot.slane %v567_v4, %v1332_v44 }
  0x52   : > { %v901_v15 = vrot.slane %v567_v4, %v1335_v46  ;;  %v912_v18 = vrot.slane %v567_v4, %v1338_v48 }
  0x54   : > { %599 = vbcast.lane.b32.xlu1 %v593_v39, 264  ;;  %595 = vbcast.lane.b32.xlu0 %v593_v39, 256 }
  0x58   : > { %610 = vbcast.lane.b32.xlu1 %v604_v41, 264  ;;  %606 = vbcast.lane.b32.xlu0 %v604_v41, 256 }
  0x5c   : > { %621 = vbcast.lane.b32.xlu1 %v615_v43, 264  ;;  %617 = vbcast.lane.b32.xlu0 %v615_v43, 256 }
  0x60   : > { %632 = vbcast.lane.b32.xlu1 %v626_v45, 264  ;;  %628 = vbcast.lane.b32.xlu0 %v626_v45, 256 }
  0x64   : > { %643 = vbcast.lane.b32.xlu1 %v637_v47, 264  ;;  %639 = vbcast.lane.b32.xlu0 %v637_v47, 256 }
  0x68   : > { %654 = vbcast.lane.b32.xlu1 %v648_v49, 264  ;;  %650 = vbcast.lane.b32.xlu0 %v648_v49, 256 }
  0x6c   : > { %665 = vbcast.lane.b32.xlu1 %v659_v51, 264  ;;  %661 = vbcast.lane.b32.xlu0 %v659_v51, 256 }
  0x70   : > { %676 = vbcast.lane.b32.xlu1 %v670_v52, 264  ;;  %672 = vbcast.lane.b32.xlu0 %v670_v52, 256 }
  0x74   : > { %687 = vbcast.lane.b32.xlu1 %v681_v53, 264  ;;  %683 = vbcast.lane.b32.xlu0 %v681_v53, 256 }
  0x78   : > { %698 = vbcast.lane.b32.xlu1 %v692_v54, 264  ;;  %694 = vbcast.lane.b32.xlu0 %v692_v54, 256 }
  0x7c   : > { %709 = vbcast.lane.b32.xlu1 %v703_v55, 264  ;;  %705 = vbcast.lane.b32.xlu0 %v703_v55, 256 }
  0x80   : > { %720 = vbcast.lane.b32.xlu1 %v714_v56, 264  ;;  %716 = vbcast.lane.b32.xlu0 %v714_v56, 256 }
  0x84   : > { %731 = vbcast.lane.b32.xlu1 %v725_v57, 264  ;;  %727 = vbcast.lane.b32.xlu0 %v725_v57, 256 }
  0x88   : > { %742 = vbcast.lane.b32.xlu1 %v736_v58, 264  ;;  %738 = vbcast.lane.b32.xlu0 %v736_v58, 256 }
  0x8c   : > { %753 = vbcast.lane.b32.xlu1 %v747_v60, 264  ;;  %749 = vbcast.lane.b32.xlu0 %v747_v60, 256 }
  0x90   : > { %764 = vbcast.lane.b32.xlu1 %v758_v61, 264  ;;  %760 = vbcast.lane.b32.xlu0 %v758_v61, 256 }
  0x94   : > { %775 = vbcast.lane.b32.xlu1 %v769_v62, 264  ;;  %771 = vbcast.lane.b32.xlu0 %v769_v62, 256 }
  0x98   : > { %786 = vbcast.lane.b32.xlu1 %v780_v63, 264  ;;  %782 = vbcast.lane.b32.xlu0 %v780_v63, 256 }
  0x9c   : > { %797 = vbcast.lane.b32.xlu1 %v791_v0, 264  ;;  %793 = vbcast.lane.b32.xlu0 %v791_v0, 256 }
  0xa0   : > { %808 = vbcast.lane.b32.xlu1 %v802_v1, 264  ;;  %804 = vbcast.lane.b32.xlu0 %v802_v1, 256 }
  0xa4   : > { %819 = vbcast.lane.b32.xlu1 %v813_v2, 264  ;;  %815 = vbcast.lane.b32.xlu0 %v813_v2, 256 }
  0xa8   : > { %830 = vbcast.lane.b32.xlu1 %v824_v3, 264  ;;  %826 = vbcast.lane.b32.xlu0 %v824_v3, 256 }
  0xac   : > { %841 = vbcast.lane.b32.xlu1 %v835_v5, 264  ;;  %837 = vbcast.lane.b32.xlu0 %v835_v5, 256 }
  0xb0   : > { %852 = vbcast.lane.b32.xlu1 %v846_v6, 264  ;;  %848 = vbcast.lane.b32.xlu0 %v846_v6, 256 }
  0xb4   : > { %863 = vbcast.lane.b32.xlu1 %v857_v7, 264  ;;  %859 = vbcast.lane.b32.xlu0 %v857_v7, 256 }
  0xb8   : > { %874 = vbcast.lane.b32.xlu1 %v868_v8, 264  ;;  %870 = vbcast.lane.b32.xlu0 %v868_v8, 256 }
  0xbc   : > { %885 = vbcast.lane.b32.xlu1 %v879_v9, 264  ;;  %881 = vbcast.lane.b32.xlu0 %v879_v9, 256 }
  0xbe   : > { %v585_v11 = vpop.permute.xlu1 %584  ;;  %v574_v12 = vpop.permute.xlu0 %573 }
  0xbf   : > { %923 = vst.msk [vmem:[%s1090_s15 + $0x10] sm:$0xff] %vm920_vm1, %v585_v11  ;;  %921 = vst.msk [vmem:[%s1090_s15] sm:$0xff] %vm920_vm1, %v574_v12 }
  0xc0   : > { %896 = vbcast.lane.b32.xlu1 %v890_v10, 264  ;;  %892 = vbcast.lane.b32.xlu0 %v890_v10, 256 }
  0xc2   : > { %v589_v16 = vpop.permute.xlu1 %588  ;;  %v578_v17 = vpop.permute.xlu0 %577 }
  0xc3   : > { %924 = vst.msk [vmem:[%s1090_s15 + $0x18] sm:$0xff] %vm920_vm1, %v589_v16  ;;  %922 = vst.msk [vmem:[%s1090_s15 + $0x8] sm:$0xff] %vm920_vm1, %v578_v17 }
  0xc4   : > { %907 = vbcast.lane.b32.xlu1 %v901_v15, 264  ;;  %903 = vbcast.lane.b32.xlu0 %v901_v15, 256 }
  0xc6   : > { %v600_v19 = vpop.permute.xlu1 %599  ;;  %v596_v20 = vpop.permute.xlu0 %595 }
  0xc7   : > { %926 = vst.msk [vmem:[%s1090_s15 + $0x28] sm:$0xff] %vm920_vm1, %v600_v19  ;;  %925 = vst.msk [vmem:[%s1090_s15 + $0x20] sm:$0xff] %vm920_vm1, %v596_v20 }
  0xc8   : > { %918 = vbcast.lane.b32.xlu1 %v912_v18, 264  ;;  %914 = vbcast.lane.b32.xlu0 %v912_v18, 256 }
  0xca   : > { %v611_v21 = vpop.permute.xlu1 %610  ;;  %v607_v23 = vpop.permute.xlu0 %606 }
  0xcb   : > { %928 = vst.msk [vmem:[%s1090_s15 + $0x38] sm:$0xff] %vm920_vm1, %v611_v21  ;;  %927 = vst.msk [vmem:[%s1090_s15 + $0x30] sm:$0xff] %vm920_vm1, %v607_v23 }
  0xce   : > { %v622_v24 = vpop.permute.xlu1 %621  ;;  %v618_v22 = vpop.permute.xlu0 %617 }
  0xcf   : > { %930 = vst.msk [vmem:[%s1090_s15 + $0x48] sm:$0xff] %vm920_vm1, %v622_v24  ;;  %929 = vst.msk [vmem:[%s1090_s15 + $0x40] sm:$0xff] %vm920_vm1, %v618_v22 }
  0xd2   : > { %v633_v25 = vpop.permute.xlu1 %632  ;;  %v629_v26 = vpop.permute.xlu0 %628 }
  0xd3   : > { %932 = vst.msk [vmem:[%s1090_s15 + $0x58] sm:$0xff] %vm920_vm1, %v633_v25  ;;  %931 = vst.msk [vmem:[%s1090_s15 + $0x50] sm:$0xff] %vm920_vm1, %v629_v26 }
  0xd6   : > { %v644_v27 = vpop.permute.xlu1 %643  ;;  %v640_v28 = vpop.permute.xlu0 %639 }
  0xd7   : > { %934 = vst.msk [vmem:[%s1090_s15 + $0x68] sm:$0xff] %vm920_vm1, %v644_v27  ;;  %933 = vst.msk [vmem:[%s1090_s15 + $0x60] sm:$0xff] %vm920_vm1, %v640_v28 }
  0xda   : > { %v655_v13 = vpop.permute.xlu1 %654  ;;  %v651_v29 = vpop.permute.xlu0 %650 }
  0xdb   : > { %936 = vst.msk [vmem:[%s1090_s15 + $0x78] sm:$0xff] %vm920_vm1, %v655_v13  ;;  %935 = vst.msk [vmem:[%s1090_s15 + $0x70] sm:$0xff] %vm920_vm1, %v651_v29 }
  0xde   : > { %v666_v30 = vpop.permute.xlu1 %665  ;;  %v662_v31 = vpop.permute.xlu0 %661 }
  0xdf   : > { %938 = vst.msk [vmem:[%s1090_s15 + $0x88] sm:$0xff] %vm920_vm1, %v666_v30  ;;  %937 = vst.msk [vmem:[%s1090_s15 + $0x80] sm:$0xff] %vm920_vm1, %v662_v31 }
  0xe2   : > { %v677_v32 = vpop.permute.xlu1 %676  ;;  %v673_v33 = vpop.permute.xlu0 %672 }
  0xe3   : > { %940 = vst.msk [vmem:[%s1090_s15 + $0x98] sm:$0xff] %vm920_vm1, %v677_v32  ;;  %939 = vst.msk [vmem:[%s1090_s15 + $0x90] sm:$0xff] %vm920_vm1, %v673_v33 }
  0xe6   : > { %v688_v34 = vpop.permute.xlu1 %687  ;;  %v684_v35 = vpop.permute.xlu0 %683 }
  0xe7   : > { %942 = vst.msk [vmem:[%s1090_s15 + $0xa8] sm:$0xff] %vm920_vm1, %v688_v34  ;;  %941 = vst.msk [vmem:[%s1090_s15 + $0xa0] sm:$0xff] %vm920_vm1, %v684_v35 }
  0xea   : > { %v699_v36 = vpop.permute.xlu1 %698  ;;  %v695_v14 = vpop.permute.xlu0 %694 }
  0xeb   : > { %944 = vst.msk [vmem:[%s1090_s15 + $0xb8] sm:$0xff] %vm920_vm1, %v699_v36  ;;  %943 = vst.msk [vmem:[%s1090_s15 + $0xb0] sm:$0xff] %vm920_vm1, %v695_v14 }
  0xee   : > { %v710_v37 = vpop.permute.xlu1 %709  ;;  %v706_v38 = vpop.permute.xlu0 %705 }
  0xef   : > { %946 = vst.msk [vmem:[%s1090_s15 + $0xc8] sm:$0xff] %vm920_vm1, %v710_v37  ;;  %945 = vst.msk [vmem:[%s1090_s15 + $0xc0] sm:$0xff] %vm920_vm1, %v706_v38 }
  0xf2   : > { %v721_v39 = vpop.permute.xlu1 %720  ;;  %v717_v40 = vpop.permute.xlu0 %716 }
  0xf3   : > { %948 = vst.msk [vmem:[%s1090_s15 + $0xd8] sm:$0xff] %vm920_vm1, %v721_v39  ;;  %947 = vst.msk [vmem:[%s1090_s15 + $0xd0] sm:$0xff] %vm920_vm1, %v717_v40 }
  0xf6   : > { %v732_v41 = vpop.permute.xlu1 %731  ;;  %v728_v42 = vpop.permute.xlu0 %727 }
  0xf7   : > { %950 = vst.msk [vmem:[%s1090_s15 + $0xe8] sm:$0xff] %vm920_vm1, %v732_v41  ;;  %949 = vst.msk [vmem:[%s1090_s15 + $0xe0] sm:$0xff] %vm920_vm1, %v728_v42 }
  0xfa   : > { %v743_v43 = vpop.permute.xlu1 %742  ;;  %v739_v44 = vpop.permute.xlu0 %738 }
  0xfb   : > { %952 = vst.msk [vmem:[%s1090_s15 + $0xf8] sm:$0xff] %vm920_vm1, %v743_v43  ;;  %951 = vst.msk [vmem:[%s1090_s15 + $0xf0] sm:$0xff] %vm920_vm1, %v739_v44 }
  0xfe   : > { %v754_v45 = vpop.permute.xlu1 %753  ;;  %v750_v46 = vpop.permute.xlu0 %749 }
  0xff   : > { %954 = vst.msk [vmem:[%s1090_s15 + $0x108] sm:$0xff] %vm920_vm1, %v754_v45  ;;  %953 = vst.msk [vmem:[%s1090_s15 + $0x100] sm:$0xff] %vm920_vm1, %v750_v46 }
 0x102   : > { %v765_v47 = vpop.permute.xlu1 %764  ;;  %v761_v48 = vpop.permute.xlu0 %760 }
 0x103   : > { %956 = vst.msk [vmem:[%s1090_s15 + $0x118] sm:$0xff] %vm920_vm1, %v765_v47  ;;  %955 = vst.msk [vmem:[%s1090_s15 + $0x110] sm:$0xff] %vm920_vm1, %v761_v48 }
 0x106   : > { %v776_v49 = vpop.permute.xlu1 %775  ;;  %v772_v50 = vpop.permute.xlu0 %771 }
 0x107   : > { %958 = vst.msk [vmem:[%s1090_s15 + $0x128] sm:$0xff] %vm920_vm1, %v776_v49  ;;  %957 = vst.msk [vmem:[%s1090_s15 + $0x120] sm:$0xff] %vm920_vm1, %v772_v50 }
 0x10a   : > { %v787_v51 = vpop.permute.xlu1 %786  ;;  %v783_v52 = vpop.permute.xlu0 %782 }
 0x10b   : > { %960 = vst.msk [vmem:[%s1090_s15 + $0x138] sm:$0xff] %vm920_vm1, %v787_v51  ;;  %959 = vst.msk [vmem:[%s1090_s15 + $0x130] sm:$0xff] %vm920_vm1, %v783_v52 }
 0x10e   : > { %v798_v53 = vpop.permute.xlu1 %797  ;;  %v794_v54 = vpop.permute.xlu0 %793 }
 0x10f   : > { %962 = vst.msk [vmem:[%s1090_s15 + $0x148] sm:$0xff] %vm920_vm1, %v798_v53  ;;  %961 = vst.msk [vmem:[%s1090_s15 + $0x140] sm:$0xff] %vm920_vm1, %v794_v54 }
 0x112   : > { %v809_v55 = vpop.permute.xlu1 %808  ;;  %v805_v56 = vpop.permute.xlu0 %804 }
 0x113   : > { %964 = vst.msk [vmem:[%s1090_s15 + $0x158] sm:$0xff] %vm920_vm1, %v809_v55  ;;  %963 = vst.msk [vmem:[%s1090_s15 + $0x150] sm:$0xff] %vm920_vm1, %v805_v56 }
 0x116   : > { %v820_v57 = vpop.permute.xlu1 %819  ;;  %v816_v58 = vpop.permute.xlu0 %815 }
 0x117   : > { %966 = vst.msk [vmem:[%s1090_s15 + $0x168] sm:$0xff] %vm920_vm1, %v820_v57  ;;  %965 = vst.msk [vmem:[%s1090_s15 + $0x160] sm:$0xff] %vm920_vm1, %v816_v58 }
 0x11a   : > { %v831_v59 = vpop.permute.xlu1 %830  ;;  %v827_v60 = vpop.permute.xlu0 %826 }
 0x11b   : > { %968 = vst.msk [vmem:[%s1090_s15 + $0x178] sm:$0xff] %vm920_vm1, %v831_v59  ;;  %967 = vst.msk [vmem:[%s1090_s15 + $0x170] sm:$0xff] %vm920_vm1, %v827_v60 }
 0x11e   : > { %v842_v61 = vpop.permute.xlu1 %841  ;;  %v838_v62 = vpop.permute.xlu0 %837 }
 0x11f   : > { %970 = vst.msk [vmem:[%s1090_s15 + $0x188] sm:$0xff] %vm920_vm1, %v842_v61  ;;  %969 = vst.msk [vmem:[%s1090_s15 + $0x180] sm:$0xff] %vm920_vm1, %v838_v62 }
 0x122   : > { %v853_v63 = vpop.permute.xlu1 %852  ;;  %v849_v0 = vpop.permute.xlu0 %848 }
 0x123   : > { %972 = vst.msk [vmem:[%s1090_s15 + $0x198] sm:$0xff] %vm920_vm1, %v853_v63  ;;  %971 = vst.msk [vmem:[%s1090_s15 + $0x190] sm:$0xff] %vm920_vm1, %v849_v0 }
 0x126   : > { %v864_v1 = vpop.permute.xlu1 %863  ;;  %v860_v2 = vpop.permute.xlu0 %859 }
 0x127   : > { %974 = vst.msk [vmem:[%s1090_s15 + $0x1a8] sm:$0xff] %vm920_vm1, %v864_v1  ;;  %973 = vst.msk [vmem:[%s1090_s15 + $0x1a0] sm:$0xff] %vm920_vm1, %v860_v2 }
 0x12a   : > { %v875_v3 = vpop.permute.xlu1 %874  ;;  %v871_v4 = vpop.permute.xlu0 %870 }
 0x12b   : > { %976 = vst.msk [vmem:[%s1090_s15 + $0x1b8] sm:$0xff] %vm920_vm1, %v875_v3  ;;  %975 = vst.msk [vmem:[%s1090_s15 + $0x1b0] sm:$0xff] %vm920_vm1, %v871_v4 }
 0x12e   : > { %v886_v5 = vpop.permute.xlu1 %885  ;;  %v882_v6 = vpop.permute.xlu0 %881 }
 0x12f   : > { %978 = vst.msk [vmem:[%s1090_s15 + $0x1c8] sm:$0xff] %vm920_vm1, %v886_v5  ;;  %977 = vst.msk [vmem:[%s1090_s15 + $0x1c0] sm:$0xff] %vm920_vm1, %v882_v6 }
 0x132   : > { %v897_v7 = vpop.permute.xlu1 %896  ;;  %v893_v8 = vpop.permute.xlu0 %892 }
 0x133   : > { %980 = vst.msk [vmem:[%s1090_s15 + $0x1d8] sm:$0xff] %vm920_vm1, %v897_v7  ;;  %979 = vst.msk [vmem:[%s1090_s15 + $0x1d0] sm:$0xff] %vm920_vm1, %v893_v8 }
 0x136   : > { %v908_v9 = vpop.permute.xlu1 %907  ;;  %v904_v10 = vpop.permute.xlu0 %903 }
 0x137   : > { %982 = vst.msk [vmem:[%s1090_s15 + $0x1e8] sm:$0xff] %vm920_vm1, %v908_v9  ;;  %981 = vst.msk [vmem:[%s1090_s15 + $0x1e0] sm:$0xff] %vm920_vm1, %v904_v10 }
 0x13a   : > { %v919_v11 = vpop.permute.xlu1 %918  ;;  %v915_v12 = vpop.permute.xlu0 %914 }
 0x13b   : > { %984 = vst.msk [vmem:[%s1090_s15 + $0x1f8] sm:$0xff] %vm920_vm1, %v919_v11  ;;  %983 = vst.msk [vmem:[%s1090_s15 + $0x1f0] sm:$0xff] %vm920_vm1, %v915_v12 }
 0x13c PF: > { %s12_s9 = sadd.s32 1, %s1058_s9  }
 0x13d   : > { %p9_p6 = scmp.ge.s32.totalorder %s12_s9, 4  }
 0x13f   :  { %11 = sbr.rel (!%p9_p6) target bundleno = 1 (0x1), region = 63 }

</bundles_post_ra>
